<compile_context>
chip_gen: v7x
topology: tpu7x:2x2x1
jax: 0.10.0
libtpu: 0.0.40
codegen_flags: <defaults>
</compile_context>

<pallas_src>
import jax
import jax.numpy as jnp
from jax.experimental import pallas as pl
from jax.experimental.pallas import tpu as pltpu


def _round_up(n, m):
    return (n + m - 1) // m * m


def _pick_tb(batch):
    """Batch tile: capped at 512 (measured tiling sweet spot), >=2 grid steps when possible
    so v7x's two TensorCores both get work, floor of 128 (full MXU/vreg row block)."""
    tb = min(512, _round_up(max(batch, 1), 256) // 2)
    return max(tb, 128)


def _sigmoid(x):
    # Exact sigmoid via a single EUP tanh; the 0.5*x / *0.5 / +0.5 ride in free VALU slots.
    return 0.5 * jnp.tanh(0.5 * x) + 0.5


def dense_mlp_kernel(x_ref, w1_ref, b1_ref, w2_ref, b2_ref, w3_ref, b3_ref, o_ref):
    # x arrives f32 from HBM; cast to bf16 in-kernel (VPU is idle here) for the MXU fast path.
    x = x_ref[...].astype(jnp.bfloat16)
    # Layer 1: Linear + Sigmoid  (bf16 MXU inputs, f32 accumulate / activations)
    h = jnp.dot(x, w1_ref[...], preferred_element_type=jnp.float32)
    h = _sigmoid(h + b1_ref[...])
    # Layer 2: Linear + Sigmoid
    h = jnp.dot(h.astype(jnp.bfloat16), w2_ref[...], preferred_element_type=jnp.float32)
    h = _sigmoid(h + b2_ref[...])
    # Layer 3: Linear + Tanh
    h = jnp.dot(h.astype(jnp.bfloat16), w3_ref[...], preferred_element_type=jnp.float32)
    o_ref[...] = jnp.tanh(h + b3_ref[...]).astype(o_ref.dtype)


def dense_forward(x, params, out_dim, *, tb=None):
    """x: (B, D_in) float32. params: lane-padded (w1,b1,w2,b2,w3,b3); weights bf16, biases f32.

    Returns (B, out_dim) float32, matching the PyTorch module's forward
    (up to bf16 rounding of the matmul inputs).
    """
    w1, b1, w2, b2, w3, b3 = params
    B, d_in = x.shape
    h1, h2, h3 = w1.shape[1], w2.shape[1], w3.shape[1]
    if tb is None:
        tb = _pick_tb(B)

    const = lambda i: (0, 0)  # weights/biases: same block every step -> DMA'd once, resident
    out = pl.pallas_call(
        dense_mlp_kernel,
        out_shape=jax.ShapeDtypeStruct((B, h3), jnp.float32),
        grid=(pl.cdiv(B, tb),),          # ragged final tile handled by Pallas (no jnp.pad pass)
        in_specs=[
            pl.BlockSpec((tb, d_in), lambda i: (i, 0)),   # x tile, pipelined over batch
            pl.BlockSpec((d_in, h1), const),
            pl.BlockSpec((1, h1), const),
            pl.BlockSpec((h1, h2), const),
            pl.BlockSpec((1, h2), const),
            pl.BlockSpec((h2, h3), const),
            pl.BlockSpec((1, h3), const),
        ],
        out_specs=pl.BlockSpec((tb, h3), lambda i: (i, 0)),  # lane-dense (h3 % 128 == 0)
        compiler_params=pltpu.CompilerParams(
            dimension_semantics=("parallel",),  # shard batch steps across both TCs on v7x
        ),
    )(x, w1, b1, w2, b2, w3, b3)
    # Only a lane slice remains (128 -> out_dim); callers that accept the padded slab can skip it.
    return out if out_dim == h3 else out[:, :out_dim]


def init_linear(key, fan_in, fan_out):
    """PyTorch nn.Linear default init: U(-1/sqrt(fan_in), 1/sqrt(fan_in)).

    Weight stored as (fan_in, fan_out) (pre-transposed for x @ W); bias as (1, fan_out).
    """
    kw, kb = jax.random.split(key)
    bound = 1.0 / jnp.sqrt(jnp.float32(fan_in))
    w = jax.random.uniform(kw, (fan_in, fan_out), jnp.float32, -bound, bound)
    b = jax.random.uniform(kb, (1, fan_out), jnp.float32, -bound, bound)
    return w, b


def pad_linear(w, b, in_pad, out_pad, weight_dtype=jnp.bfloat16):
    """Zero-pad params to lane-dense shapes (one-time, not per-call); zero padding guarantees
    sigmoid(0)=0.5 values on padded hidden lanes never leak into real output lanes."""
    wp = jnp.zeros((in_pad, out_pad), jnp.float32).at[: w.shape[0], : w.shape[1]].set(w)
    bp = jnp.zeros((1, out_pad), jnp.float32).at[:, : b.shape[1]].set(b)
    return wp.astype(weight_dtype), bp


if __name__ == "__main__":
    key = jax.random.PRNGKey(0)
    kx, k1, k2, k3 = jax.random.split(key, 4)

    B, D_in = 200, 32                 # B deliberately not a multiple of the tile (ragged tile path)
    dims = [300, 100, 100]            # config=[300,'S',100,'S',100,'T']

    x = jax.random.normal(kx, (B, D_in), jnp.float32)

    w1, b1 = init_linear(k1, D_in, dims[0])
    w2, b2 = init_linear(k2, dims[0], dims[1])
    w3, b3 = init_linear(k3, dims[1], dims[2])

    # Padded feature dims: 300 -> 384, 100 -> 128 (D_in=32 stays: it is the full lane extent of x)
    p1 = _round_up(dims[0], 128)
    p2 = _round_up(dims[1], 128)
    p3 = _round_up(dims[2], 128)
    params = (
        *pad_linear(w1, b1, D_in, p1),
        *pad_linear(w2, b2, p1, p2),
        *pad_linear(w3, b3, p2, p3),
    )

    out = jax.block_until_ready(dense_forward(x, params, dims[-1]))

    # Pure-JAX reference with matching bf16 MXU inputs / f32 accumulation.
    def mm(a, w):
        return jnp.dot(a.astype(jnp.bfloat16), w.astype(jnp.bfloat16),
                       preferred_element_type=jnp.float32)

    ref = jax.nn.sigmoid(mm(x, w1) + b1)
    ref = jax.nn.sigmoid(mm(ref, w2) + b2)
    ref = jnp.tanh(mm(ref, w3) + b3)

    assert out.shape == (B, dims[-1])
    max_err = float(jnp.max(jnp.abs(out - ref)))
    assert jnp.allclose(out, ref, atol=1e-2, rtol=1e-2), f"max abs err {max_err}"

    print("KERNEL_OK")
</pallas_src>

<mosaic_0001>
module attributes {stable_mosaic.version = 11 : i64} {
  func.func @dense_mlp_kernel(%arg0: i32, %arg1: memref<128x32xf32, #tpu.memory_space<vmem>>, %arg2: memref<32x384xbf16, #tpu.memory_space<vmem>>, %arg3: memref<1x384xf32, #tpu.memory_space<vmem>>, %arg4: memref<384x128xbf16, #tpu.memory_space<vmem>>, %arg5: memref<1x128xf32, #tpu.memory_space<vmem>>, %arg6: memref<128x128xbf16, #tpu.memory_space<vmem>>, %arg7: memref<1x128xf32, #tpu.memory_space<vmem>>, %arg8: memref<128x128xf32, #tpu.memory_space<vmem>>) attributes {dimension_semantics = [#tpu.dimension_semantics<parallel>], iteration_bounds = array<i64: 2>, scalar_prefetch = 0 : i64, scratch_operands = 0 : i64, tpu.core_type = #tpu.core_type<tc>, window_params = [{transform_indices = @transform_0, window_bounds = array<i64: 128, 32>}, {pipeline_mode = #tpu.pipeline_mode<synchronous>, transform_indices = @transform_1, window_bounds = array<i64: 32, 384>}, {pipeline_mode = #tpu.pipeline_mode<synchronous>, transform_indices = @transform_2, window_bounds = array<i64: 1, 384>}, {pipeline_mode = #tpu.pipeline_mode<synchronous>, transform_indices = @transform_3, window_bounds = array<i64: 384, 128>}, {pipeline_mode = #tpu.pipeline_mode<synchronous>, transform_indices = @transform_4, window_bounds = array<i64: 1, 128>}, {pipeline_mode = #tpu.pipeline_mode<synchronous>, transform_indices = @transform_5, window_bounds = array<i64: 128, 128>}, {pipeline_mode = #tpu.pipeline_mode<synchronous>, transform_indices = @transform_6, window_bounds = array<i64: 1, 128>}, {transform_indices = @transform_7, window_bounds = array<i64: 128, 128>}]} {
    %c0 = arith.constant 0 : index
    %c0_0 = arith.constant 0 : index
    %0 = vector.load %arg1[%c0, %c0_0] : memref<128x32xf32, #tpu.memory_space<vmem>>, vector<128x32xf32>
    %1 = arith.truncf %0 : vector<128x32xf32> to vector<128x32xbf16>
    %c0_1 = arith.constant 0 : index
    %c0_2 = arith.constant 0 : index
    %2 = vector.load %arg2[%c0_1, %c0_2] : memref<32x384xbf16, #tpu.memory_space<vmem>>, vector<32x384xbf16>
    %cst = arith.constant dense<0.000000e+00> : vector<128x384xf32>
    %3 = tpu.matmul %1, %2, %cst {dimension_numbers = #tpu.dot_dimension_numbers<[1], [0], [0], [1], [0, 0, 1, 1], [], []>} : vector<128x32xbf16>, vector<32x384xbf16>, vector<128x384xf32> -> vector<128x384xf32>
    %c0_3 = arith.constant 0 : index
    %c0_4 = arith.constant 0 : index
    %4 = vector.load %arg3[%c0_3, %c0_4] : memref<1x384xf32, #tpu.memory_space<vmem>>, vector<1x384xf32>
    %5 = vector.broadcast %4 : vector<1x384xf32> to vector<128x384xf32>
    %6 = arith.addf %3, %5 : vector<128x384xf32>
    %cst_5 = arith.constant 5.000000e-01 : f32
    %7 = vector.broadcast %cst_5 : f32 to vector<128x384xf32>
    %8 = arith.mulf %7, %6 : vector<128x384xf32>
    %9 = math.tanh %8 : vector<128x384xf32>
    %cst_6 = arith.constant 5.000000e-01 : f32
    %10 = vector.broadcast %cst_6 : f32 to vector<128x384xf32>
    %11 = arith.mulf %10, %9 : vector<128x384xf32>
    %cst_7 = arith.constant 5.000000e-01 : f32
    %12 = vector.broadcast %cst_7 : f32 to vector<128x384xf32>
    %13 = arith.addf %11, %12 : vector<128x384xf32>
    %14 = arith.truncf %13 : vector<128x384xf32> to vector<128x384xbf16>
    %c0_8 = arith.constant 0 : index
    %c0_9 = arith.constant 0 : index
    %15 = vector.load %arg4[%c0_8, %c0_9] : memref<384x128xbf16, #tpu.memory_space<vmem>>, vector<384x128xbf16>
    %cst_10 = arith.constant dense<0.000000e+00> : vector<128x128xf32>
    %16 = tpu.matmul %14, %15, %cst_10 {dimension_numbers = #tpu.dot_dimension_numbers<[1], [0], [0], [1], [0, 0, 1, 1], [], []>} : vector<128x384xbf16>, vector<384x128xbf16>, vector<128x128xf32> -> vector<128x128xf32>
    %c0_11 = arith.constant 0 : index
    %c0_12 = arith.constant 0 : index
    %17 = vector.load %arg5[%c0_11, %c0_12] : memref<1x128xf32, #tpu.memory_space<vmem>>, vector<1x128xf32>
    %18 = vector.broadcast %17 : vector<1x128xf32> to vector<128x128xf32>
    %19 = arith.addf %16, %18 : vector<128x128xf32>
    %cst_13 = arith.constant 5.000000e-01 : f32
    %20 = vector.broadcast %cst_13 : f32 to vector<128x128xf32>
    %21 = arith.mulf %20, %19 : vector<128x128xf32>
    %22 = math.tanh %21 : vector<128x128xf32>
    %cst_14 = arith.constant 5.000000e-01 : f32
    %23 = vector.broadcast %cst_14 : f32 to vector<128x128xf32>
    %24 = arith.mulf %23, %22 : vector<128x128xf32>
    %cst_15 = arith.constant 5.000000e-01 : f32
    %25 = vector.broadcast %cst_15 : f32 to vector<128x128xf32>
    %26 = arith.addf %24, %25 : vector<128x128xf32>
    %27 = arith.truncf %26 : vector<128x128xf32> to vector<128x128xbf16>
    %c0_16 = arith.constant 0 : index
    %c0_17 = arith.constant 0 : index
    %28 = vector.load %arg6[%c0_16, %c0_17] : memref<128x128xbf16, #tpu.memory_space<vmem>>, vector<128x128xbf16>
    %cst_18 = arith.constant dense<0.000000e+00> : vector<128x128xf32>
    %29 = tpu.matmul %27, %28, %cst_18 {dimension_numbers = #tpu.dot_dimension_numbers<[1], [0], [0], [1], [0, 0, 1, 1], [], []>} : vector<128x128xbf16>, vector<128x128xbf16>, vector<128x128xf32> -> vector<128x128xf32>
    %c0_19 = arith.constant 0 : index
    %c0_20 = arith.constant 0 : index
    %30 = vector.load %arg7[%c0_19, %c0_20] : memref<1x128xf32, #tpu.memory_space<vmem>>, vector<1x128xf32>
    %31 = vector.broadcast %30 : vector<1x128xf32> to vector<128x128xf32>
    %32 = arith.addf %29, %31 : vector<128x128xf32>
    %33 = math.tanh %32 : vector<128x128xf32>
    %c0_21 = arith.constant 0 : index
    %c0_22 = arith.constant 0 : index
    %34 = vector.load %arg8[%c0_21, %c0_22] : memref<128x128xf32, #tpu.memory_space<vmem>>, vector<128x128xf32>
    tpu.vector_store %arg8[%c0_21, %c0_22], %33 {strides = array<i32>} : memref<128x128xf32, #tpu.memory_space<vmem>>, vector<128x128xf32>,
    return
  }
  func.func @transform_0(%arg0: i32) -> (i32, i32) {
    %c0_i32 = arith.constant 0 : i32
    %c0_i32_0 = arith.constant 0 : i32
    return %arg0, %c0_i32 : i32, i32
  }
  func.func @transform_1(%arg0: i32) -> (i32, i32) {
    %c0_i32 = arith.constant 0 : i32
    %c0_i32_0 = arith.constant 0 : i32
    %c0_i32_1 = arith.constant 0 : i32
    return %c0_i32, %c0_i32_0 : i32, i32
  }
  func.func @transform_2(%arg0: i32) -> (i32, i32) {
    %c0_i32 = arith.constant 0 : i32
    %c0_i32_0 = arith.constant 0 : i32
    %c0_i32_1 = arith.constant 0 : i32
    return %c0_i32, %c0_i32_0 : i32, i32
  }
  func.func @transform_3(%arg0: i32) -> (i32, i32) {
    %c0_i32 = arith.constant 0 : i32
    %c0_i32_0 = arith.constant 0 : i32
    %c0_i32_1 = arith.constant 0 : i32
    return %c0_i32, %c0_i32_0 : i32, i32
  }
  func.func @transform_4(%arg0: i32) -> (i32, i32) {
    %c0_i32 = arith.constant 0 : i32
    %c0_i32_0 = arith.constant 0 : i32
    %c0_i32_1 = arith.constant 0 : i32
    return %c0_i32, %c0_i32_0 : i32, i32
  }
  func.func @transform_5(%arg0: i32) -> (i32, i32) {
    %c0_i32 = arith.constant 0 : i32
    %c0_i32_0 = arith.constant 0 : i32
    %c0_i32_1 = arith.constant 0 : i32
    return %c0_i32, %c0_i32_0 : i32, i32
  }
  func.func @transform_6(%arg0: i32) -> (i32, i32) {
    %c0_i32 = arith.constant 0 : i32
    %c0_i32_0 = arith.constant 0 : i32
    %c0_i32_1 = arith.constant 0 : i32
    return %c0_i32, %c0_i32_0 : i32, i32
  }
  func.func @transform_7(%arg0: i32) -> (i32, i32) {
    %c0_i32 = arith.constant 0 : i32
    %c0_i32_0 = arith.constant 0 : i32
    return %arg0, %c0_i32 : i32, i32
  }
}

</mosaic_0001>

<bundles_post_ra>
// kernel: tpu_custom_call.1
= control target key start
LH: loop header
LB: loop body
LE: loop exit
PB: predicated region body
PF: predicated region fallthrough
CT: control target
= control target key end

     0   :  { %12 = vsyncpa [#allocation3], 0  ;;  %s2803_s0 = inlined_call_operand.vmem [shape: f32[200,32], index: 0, kind: input, shape index: {}]   ;;  %s2804_s1 = inlined_call_operand.hbm [shape: bf16[32,384], index: 1, kind: input, shape index: {}]   ;;  %s2805_s2 = inlined_call_operand.vmem [shape: f32[1,384], index: 2, kind: input, shape index: {}]   ;;  %s2806_s3 = inlined_call_operand.vmem [shape: bf16[384,128], index: 3, kind: input, shape index: {}]   ;;  %s2807_s4 = inlined_call_operand.vmem [shape: f32[1,128], index: 4, kind: input, shape index: {}]   ;;  %s2808_s5 = inlined_call_operand.vmem [shape: bf16[128,128], index: 5, kind: input, shape index: {}]   ;;  %s2809_s6 = inlined_call_operand.vmem [shape: f32[1,128], index: 6, kind: input, shape index: {}]   ;;  %s2810_s7 = inlined_call_operand.hbm [shape: f32[200,128], index: 7, kind: output, shape index: {}]  }
   0x1   :  { %13 = vsyncpa [#allocation4], 0 }
   0x2   :  { %15 = vsyncpa [#allocation4 + $0x1], 0  ;;  %s2277_s24 = smov 0   ;;  %s2279_s25 = smov 0  }
   0x3   :  { %s2281_s26 = smov 0   ;;  %s2283_s27 = smov 0  }
   0x4 LB: > { %s2298_s28 = sadd.s32 4294967295, %s2228_s27   ;;  %s1611_s29 = sadd.s32 4294967294, %s2228_s27   ;;  %s2228_s27 = sphi %s2283_s27, %s2825_s27   ;;  %s2224_s26 = sphi %s2281_s26, %s2824_s26   ;;  %s2220_s25 = sphi %s2279_s25, %s2823_s25   ;;  %s2216_s24 = sphi %s2277_s24, %s2822_s24  }
   0x5   : > { %s2302_s30 = sadd.s32 1, %s2228_s27   ;;  %s180_s8 = sadd.s32 1, %s2224_s26 }
   0x6   : > { %s177_s9 = ssub.s32 %s2228_s27, %s2302_s30  ;;  %p190_p0 = scmp.ne.s32.totalorder %s2224_s26, %s2220_s25 }
   0x7   : > { %p178_p1 = scmp.eq.s32.totalorder %s177_s9, 0  ;;  %p191_p2 = scmp.eq.s32.totalorder %s2298_s28, 1 }
   0x8   : > { %p196_p3 = scmp.ne.s32.totalorder %s2220_s25, %s2216_s24  ;;  %p197_p4 = scmp.eq.s32.totalorder %s1611_s29, 1 }
   0x9   : > { %s2313_s10 = scalar_select %p178_p1, %s2224_s26, %s180_s8  }
   0xa   : > { %p2315_p5 = por %p191_p2, %p190_p0  ;;  %p2319_p6 = por %p197_p4, %p196_p3 }
   0xb   : > { %p1612_p7 = scmp.ge.s32.totalorder %s2228_s27, 1  ;;  %p204_p8 = scmp.lt.s32.totalorder %s2228_s27, 3 }
   0xc   : > { %s2813_s11 = scalar_select %p2315_p5, 1, 0 }
   0xd   : > { %s2814_s12 = scalar_select %p2319_p6, 1, 0 }
   0xe   : > { %p2811_p9 = scmp.eq.s32.totalorder %s2298_s28, 0  ;;  %p2326_p10 = pnand %p1612_p7, %p204_p8 }
   0xf   : > { %s2230_s14 = smov [#allocation2]   ;;  %s2134_s19 = scalar_lea.hbm %s2804_s1, 768 }
  0x10   : > { %s2815_s13 = scalar_select %p2326_p10, 1, 0 }
  0x11   : > { %s216_s15 = sshll.u32 %s2230_s14, 4  ;;  %p1885_p11 = pneg %p2326_p10  ;;  %s217_s15 = int_to_ptr.vmem [resolvable:$true] %s216_s15 }
  0x12   : > { %p2135_p13 = scmp.ne.s32.totalorder %s2804_s1, %s2134_s19  ;;  %p2141_p3 = scmp.lt.u32.totalorder %s2134_s19, %s2804_s1 }
  0x13   : > { %p2334_p12 = pnand %p2811_p9, %p1885_p11 }
  0x15   : > { %p2136_p0 = pneg %p2334_p12 }
  0x17   : > { %p2137_p1 = pnand %p2136_p0, %p2135_p13 }
  0x19   : > { %p2138_p2 = pneg %p2137_p1 }
  0x1b   : > { %p2143_p4 = pnand %p2141_p3, %p2138_p2 }
  0x1d   : > { %2146 = shalt.err (!%p2143_p4)
}
  0x1e   : > { %s2147_s29 = scalar_lea.vmem %s217_s15, 768  ;;  %p2155_p9 = scmp.lt.s32.totalorder %s217_s15, %s217_s15 }
  0x1f   : > { %p2148_p7 = scmp.ne.s32.totalorder %s217_s15, %s2147_s29  ;;  %p2156_p6 = scmp.lt.s32.totalorder %s2147_s29, %s2147_s29 }
  0x21   : > { %p2150_p8 = pnand %p2148_p7, %p2136_p0  ;;  %p2157_p5 = por %p2156_p6, %p2155_p9 }
  0x23   : > { %p2151_p11 = pneg %p2150_p8 }
  0x25   : > { %p2158_p10 = pnand %p2157_p5, %p2151_p11 }
  0x27   : > { %2161 = shalt.err (!%p2158_p10)
}
  0x28   : > { %s2231_s8 = smov 192   ;;  %s2232_s9 = smov 12  }
  0x29   : > { %1888 = dma.hbm_to_vmem [thread:$0]  (!%p2334_p12), %s2804_s1, 768, %s217_s15, [#allocation3], %s2231_s8, %s2231_s8, %s2232_s9  }
  0x2a   : > { %p2817_p13 = scmp.ne.s32.totalorder %s2815_s13, 0 }
  0x2b   : > { %p2818_p1 = scmp.eq.s32.totalorder (!%p2817_p13), %s2298_s28, 0 }
  0x2c   : > { %264 = sbr.rel (%p2817_p13) target bundleno = 868 (0x364), region = 48 }
  0x33   : > { %2207 = dma.done.wait (%p2818_p1), [#allocation3], 768   ;;  %p2819_p0 = pmov %p2818_p1 }
  0x34   : > { %s2361_s18 = sshll.u32 %s2298_s28, 4  ;;  %v2233_v0 = vmov 0   ;;  %v1934_v1 = vld [vmem:[#allocation2 + $0x4] ss:$12 sps:$4 sm:$0xff]   ;;  %v1936_v2 = vld [vmem:[#allocation2] ss:$12 sps:$4 sm:$0xff]   ;;  %v354_v55 = vlaneseq }
  0x35   : > { %2209 = vsyncadd (%p2819_p0), [#allocation3], 4294966528  ;;  %458 = vmatprep.mubr.bf16.mxu0 %v2233_v0  ;;  %518 = vmatprep.mubr.bf16.mxu1 %v2233_v0  ;;  %p305_p5 = scmp.lt.s32.totalorder %s2361_s18, 24  ;;  %v1937_v3 = vld [vmem:[#allocation2 + $0x1c] ss:$12 sps:$4 sm:$0xff]   ;;  %vm401_vm0 = vcmask 261120  }
  0x36   : > { %426 = vmatprep.subr.bf16.mxu0 %v1934_v1  ;;  %1876 = vmatprep.subr.bf16.mxu1 %v1934_v1  ;;  %v1939_v4 = vld [vmem:[#allocation2 + $0x18] ss:$12 sps:$4 sm:$0xff]   ;;  %v1940_v11 = vld [vmem:[#allocation2 + $0x8] ss:$12 sps:$4 sm:$0xff]   ;;  %v1941_v14 = vld [vmem:[#allocation2 + $0x20] ss:$12 sps:$4 sm:$0xff]  }
  0x37   : > { %s306_s15 = scalar_select %p305_p5, %s2361_s18, 24  ;;  %427 = vmatpush1.bf16.msra.mxu0 %v1936_v2  ;;  %1878 = vmatpush1.bf16.msra.mxu1 %v1936_v2  ;;  %v1942_v17 = vld [vmem:[%s2806_s3 + $0x40] sm:$0xff]   ;;  %v1944_v24 = vld [vmem:[%s2806_s3 + $0x48] sm:$0xff]   ;;  %v1946_v35 = vld [vmem:[%s2806_s3 + $0x50] sm:$0xff]   ;;  %v355_v56 = vshrl.u32 %v354_v55, 7 }
  0x38   : > { %428 = vmatprep.subr.bf16.mxu0 %v1937_v3  ;;  %1877 = vmatprep.subr.bf16.mxu1 %v1937_v3  ;;  %v1943_v23 = vld [vmem:[%s2806_s3] sm:$0xff]   ;;  %v1945_v27 = vld [vmem:[%s2806_s3 + $0x8] sm:$0xff]   ;;  %v1947_v36 = vld [vmem:[%s2806_s3 + $0x10] sm:$0xff]   ;;  %s297_s29 = sand.u32 1, %s2220_s25   ;;  %p2820_p6 = scmp.ne.s32.totalorder %s2813_s11, 0 }
  0x39   : > { %s1619_s13 = sshll.u32 %s306_s15, 3  ;;  %v1948_v37 = vld [vmem:[%s2806_s3 + $0x58] sm:$0xff]   ;;  %v1950_v39 = vld [vmem:[%s2806_s3 + $0x60] sm:$0xff]   ;;  %v1953_v42 = vld [vmem:[%s2806_s3 + $0x68] sm:$0xff]   ;;  %v356_v57 = vsub.s32 0, %v355_v56  ;;  %v360_v59 = vsub.s32 1, %v355_v56 }
  0x3a   : > { %s2370_s20 = scalar_lea.vmem %s2803_s0, %s1619_s13  ;;  %v1949_v38 = vld [vmem:[%s2806_s3 + $0x18] sm:$0xff]   ;;  %v1952_v40 = vld [vmem:[%s2806_s3 + $0x80] sm:$0xff]   ;;  %v1955_v43 = vld [vmem:[%s2806_s3 + $0x88] sm:$0xff]   ;;  %s1617_s14 = sshll.u32 %s297_s29, 7 }
  0x3b   : > { %v320_v5 = vld [vmem:[%s2370_s20] sm:$0xff]  ;;  %v321_v6 = vld [vmem:[%s2370_s20 + $0x8] sm:$0xff]  ;;  %429 = vmatpush1.bf16.msra.mxu0 %v1939_v4  ;;  %1879 = vmatpush1.bf16.msra.mxu1 %v1939_v4  ;;  %v322_v12 = vld [vmem:[%s2370_s20 + $0x10] sm:$0xff]  ;;  %s2711_s17 = scalar_lea.vmem [#allocation5], %s1617_s14  ;;  %s2742_s15 = scalar_lea.sflag [#allocation4], %s297_s29 }
  0x3c   : > { %v332_v7 = vld [vmem:[%s2370_s20 + $0x60] sm:$0xff]  ;;  %v333_v8 = vld [vmem:[%s2370_s20 + $0x68] sm:$0xff]  ;;  %v336_v9 = vpack.c.bf16 %v321_v6, %v320_v5  ;;  %1792 = vmatprep.subr.bf16.mxu1 %v1940_v11  ;;  %v323_v13 = vld [vmem:[%s2370_s20 + $0x18] sm:$0xff]  ;;  %1812 = vmatprep.subr.bf16.mxu0 %v1952_v40  ;;  %s1526_s13 = ssub.s32 (%p2820_p6), 25, %s2361_s18 }
  0x3d   : > { %v342_v10 = vpack.c.bf16 %v333_v8, %v332_v7  ;;  %v334_v15 = vld [vmem:[%s2370_s20 + $0x70] sm:$0xff]  ;;  %v335_v16 = vld [vmem:[%s2370_s20 + $0x78] sm:$0xff]  ;;  %v337_v18 = vpack.c.bf16 %v323_v13, %v322_v12  ;;  %v324_v20 = vld [vmem:[%s2370_s20 + $0x20] sm:$0xff]  ;;  %p1527_p9 = scmp.lt.s32.totalorder (%p2820_p6), %s1526_s13, 16 }
  0x3e   : > { %1626 = vmatmul.mubr.msk.bf16.vlgmr.msra.gmra.mrb[0].mxu0 %vm401_vm0, %v336_v9  ;;  %v343_v19 = vpack.c.bf16 %v335_v16, %v334_v15  ;;  %v325_v21 = vld [vmem:[%s2370_s20 + $0x28] sm:$0xff]  ;;  %v326_v25 = vld [vmem:[%s2370_s20 + $0x30] sm:$0xff]  ;;  %v327_v26 = vld [vmem:[%s2370_s20 + $0x38] sm:$0xff] }
  0x3f   : > { %1632 = vmatmul.mubr.msk.bf16.vlgmr.msra.gmra.mrb[0].mxu1 %vm401_vm0, %v342_v10  ;;  %468 = vmatprep.mubr.bf16.mxu0 %v2233_v0  ;;  %v338_v22 = vpack.c.bf16 %v325_v21, %v324_v20  ;;  %v328_v28 = vld [vmem:[%s2370_s20 + $0x40] sm:$0xff]  ;;  %v329_v29 = vld [vmem:[%s2370_s20 + $0x48] sm:$0xff]  ;;  %v339_v30 = vpack.c.bf16 %v327_v26, %v326_v25  ;;  %v330_v32 = vld [vmem:[%s2370_s20 + $0x50] sm:$0xff]  ;;  %v364_v21 = vsub.s32 2, %v355_v56 }
  0x40   : > { %528 = vmatprep.mubr.bf16.mxu1 %v2233_v0  ;;  %1793 = vmatpush3.bf16.msra.mxu1 %v1940_v11  ;;  %v340_v31 = vpack.c.bf16 %v329_v29, %v328_v28  ;;  %v331_v33 = vld [vmem:[%s2370_s20 + $0x58] sm:$0xff]  ;;  %v1951_v41 = vld [vmem:[%s2806_s3 + $0x20] sm:$0xff]   ;;  %v1954_v44 = vld [vmem:[%s2806_s3 + $0x28] sm:$0xff]  }
  0x41   : > { %1794 = vmatprep.subr.bf16.mxu1 %v1941_v14  ;;  %v341_v34 = vpack.c.bf16 %v331_v33, %v330_v32  ;;  %1813 = vmatpush3.bf16.msra.mxu0 %v1952_v40  ;;  %v1956_v45 = vld [vmem:[%s2806_s3 + $0x70] sm:$0xff]   ;;  %v1959_v48 = vld [vmem:[%s2806_s3 + $0x78] sm:$0xff]   ;;  %v1962_v51 = vld [vmem:[%s2806_s3 + $0xa0] sm:$0xff]  }
  0x42   : > { %1814 = vmatprep.subr.bf16.mxu0 %v1955_v43  ;;  %v1958_v46 = vld [vmem:[%s2806_s3 + $0x90] sm:$0xff]   ;;  %v1961_v49 = vld [vmem:[%s2806_s3 + $0x98] sm:$0xff]   ;;  %v1963_v52 = vld [vmem:[%s2806_s3 + $0xa8] sm:$0xff]  }
  0x43   : > { %v1957_v47 = vld [vmem:[%s2806_s3 + $0x30] sm:$0xff]   ;;  %v1960_v50 = vld [vmem:[%s2806_s3 + $0x38] sm:$0xff]   ;;  %v352_v58 = vld [vmem:[%s2805_s2] sm:$0x7] }
  0x44   : > { %1795 = vmatpush3.bf16.msra.mxu1 %v1941_v14  ;;  %v1964_v53 = vld [vmem:[%s2806_s3 + $0xb0] sm:$0xff]   ;;  %v1965_v54 = vld [vmem:[%s2806_s3 + $0xb8] sm:$0xff]   ;;  %v2485_v60 = vrot.slane %v352_v58, %v356_v57  ;;  %v2487_v61 = vrot.slane %v352_v58, %v360_v59 }
  0x45   : > { %1696 = vmatprep.subr.bf16.mxu1 %v1942_v17  ;;  %1815 = vmatpush3.bf16.msra.mxu0 %v1955_v43 }
  0x46   : > { %1627 = vmatmul.mubr.msk.bf16.gmra.mrb[4].mxu0 %vm401_vm0, %v337_v18  ;;  %1816 = vmatprep.subr.bf16.mxu0 %v1958_v46 }
  0x47   : > { %1633 = vmatmul.mubr.msk.bf16.gmra.mrb[4].mxu1 %vm401_vm0, %v343_v19  ;;  %478 = vmatprep.mubr.bf16.mxu0 %v2233_v0 }
  0x48   : > { %1796 = vmatprep.mubr.msk.bf16.mxu1 %vm401_vm0, %v336_v9 }
  0x49   : > { %1817 = vmatpush3.bf16.msra.mxu0 %v1958_v46 }
  0x4a   : > { %1818 = vmatprep.subr.bf16.mxu0 %v1961_v49 }
  0x4d   : > { %1819 = vmatpush3.bf16.msra.mxu0 %v1961_v49 }
  0x4e   : > { %1628 = vmatmul.mubr.msk.bf16.gmra.mrb[8].mxu0 %vm401_vm0, %v338_v22  ;;  %1820 = vmatprep.subr.bf16.mxu0 %v1962_v51 }
  0x4f   : > { %1797 = vmatmul.mubr.msk.bf16.vlgmr.msra.gmra.mrb[8].mxu1 %vm401_vm0, %v337_v18  ;;  %488 = vmatprep.mubr.bf16.mxu0 %v2233_v0 }
  0x50   : > { %1800 = vmatprep.mubr.msk.bf16.mxu1 %vm401_vm0, %v338_v22  ;;  %1697 = vmatpush3.bf16.msra.mxu1 %v1943_v23 }
  0x51   : > { %1698 = vmatprep.subr.bf16.mxu1 %v1944_v24  ;;  %1821 = vmatpush3.bf16.msra.mxu0 %v1962_v51 }
  0x52   : > { %1822 = vmatprep.subr.bf16.mxu0 %v1963_v52 }
  0x54   : > { %1699 = vmatpush3.bf16.msra.mxu1 %v1945_v27 }
  0x55   : > { %1700 = vmatprep.subr.bf16.mxu1 %v1946_v35  ;;  %1823 = vmatpush3.bf16.msra.mxu0 %v1963_v52 }
  0x56   : > { %1629 = vmatmul.mubr.msk.bf16.gmra.mrb[12].mxu0 %vm401_vm0, %v339_v30  ;;  %1824 = vmatprep.subr.bf16.mxu0 %v1964_v53 }
  0x57   : > { %1801 = vmatmul.mubr.msk.bf16.gmra.mrb[12].mxu1 %vm401_vm0, %v339_v30  ;;  %498 = vmatprep.mubr.bf16.mxu0 %v2233_v0 }
  0x58   : > { %1804 = vmatprep.mubr.msk.bf16.mxu1 %vm401_vm0, %v340_v31  ;;  %1701 = vmatpush3.bf16.msra.mxu1 %v1947_v36 }
  0x59   : > { %1702 = vmatprep.subr.bf16.mxu1 %v1948_v37  ;;  %1825 = vmatpush3.bf16.msra.mxu0 %v1964_v53  ;;  %v2502_v37 = vrot.slane %v352_v58, %v364_v21 }
  0x5a   : > { %1826 = vmatprep.subr.bf16.mxu0 %v1965_v54 }
  0x5c   : > { %1703 = vmatpush3.bf16.msra.mxu1 %v1949_v38 }
  0x5d   : > { %1704 = vmatprep.subr.bf16.mxu1 %v1950_v39  ;;  %1827 = vmatpush3.bf16.msra.mxu0 %v1965_v54 }
  0x5e   : > { %1630 = vmatmul.mubr.msk.bf16.gmra.mrb[16].mxu0 %vm401_vm0, %v340_v31 }
  0x5f   : > { %1805 = vmatmul.mubr.msk.bf16.gmra.mrb[16].mxu1 %vm401_vm0, %v341_v34  ;;  %508 = vmatprep.mubr.bf16.mxu0 %v2233_v0 }
  0x60   : > { %1808 = vmatprep.mubr.msk.bf16.mxu1 %vm401_vm0, %v342_v10  ;;  %1705 = vmatpush3.bf16.msra.mxu1 %v1951_v41 }
  0x61   : > { %1706 = vmatprep.subr.bf16.mxu1 %v1953_v42 }
  0x64   : > { %1707 = vmatpush3.bf16.msra.mxu1 %v1954_v44 }
  0x65   : > { %1708 = vmatprep.subr.bf16.mxu1 %v1956_v45 }
  0x66   : > { %1631 = vmatmul.mubr.msk.bf16.gmra.mrb[20].mxu0 %vm401_vm0, %v341_v34 }
  0x67   : > { %1809 = vmatmul.mubr.msk.bf16.gmra.mrb[20].mxu1 %vm401_vm0, %v343_v19 }
  0x68   : > { %1709 = vmatpush3.bf16.msra.mxu1 %v1957_v47 }
  0x69   : > { %1710 = vmatprep.subr.bf16.mxu1 %v1959_v48 }
  0x6c   : > { %1711 = vmatpush3.bf16.msra.mxu1 %v1960_v50 }
 0x111   : > { %v460_v62 = vpop.f32.mrb[0].mxu0 }
 0x112   : > { %v520_v63 = vpop.f32.mrb[0].mxu1  ;;  %v461_v0 = vadd.f32 %v460_v62, %v2485_v60  ;;  %v462_v1 = vpop.f32.mrb[1].mxu0 }
 0x113   : > { %v521_v2 = vadd.f32 %v520_v63, %v2485_v60  ;;  %v522_v3 = vpop.f32.mrb[1].mxu1  ;;  %v463_v4 = vadd.f32 %v462_v1, %v2487_v61  ;;  %v464_v5 = vpop.f32.mrb[2].mxu0 }
 0x114   : > { %v523_v6 = vadd.f32 %v522_v3, %v2487_v61  ;;  %v524_v7 = vpop.f32.mrb[2].mxu1  ;;  %v636_v8 = vmul.f32 0.5, %v461_v0  ;;  %v465_v9 = vadd.f32 %v464_v5, %v2485_v60  ;;  %v466_v10 = vpop.f32.mrb[3].mxu0 }
 0x115   : > { %v525_v11 = vadd.f32 %v524_v7, %v2485_v60  ;;  %v526_v12 = vpop.f32.mrb[3].mxu1  ;;  %v637_v13 = vmul.f32 0.5, %v463_v4  ;;  %v467_v14 = vadd.f32 %v466_v10, %v2487_v61  ;;  %v672_v17 = vmul.f32 0.5, %v521_v2 }
 0x116   : > { %v527_v15 = vadd.f32 %v526_v12, %v2487_v61  ;;  %1974 = vtanh.f32 %v636_v8  ;;  %v639_v16 = vmul.f32 0.5, %v465_v9  ;;  %v673_v19 = vmul.f32 0.5, %v523_v6 }
 0x117   : > { %1976 = vtanh.f32 %v637_v13  ;;  %v640_v18 = vmul.f32 0.5, %v467_v14  ;;  %v675_v20 = vmul.f32 0.5, %v525_v11 }
 0x118   : > { %1978 = vtanh.f32 %v639_v16  ;;  %v676_v23 = vmul.f32 0.5, %v527_v15 }
 0x119   : > { %1980 = vtanh.f32 %v640_v18  ;;  %v470_v22 = vpop.f32.mrb[4].mxu0 }
 0x11a   : > { %v530_v24 = vpop.f32.mrb[4].mxu1  ;;  %v471_v25 = vadd.f32 %v470_v22, %v2485_v60  ;;  %1982 = vtanh.f32 %v672_v17  ;;  %v472_v26 = vpop.f32.mrb[5].mxu0 }
 0x11b   : > { %v531_v27 = vadd.f32 %v530_v24, %v2485_v60  ;;  %v532_v28 = vpop.f32.mrb[5].mxu1  ;;  %v473_v29 = vadd.f32 %v472_v26, %v2487_v61  ;;  %1984 = vtanh.f32 %v673_v19  ;;  %v474_v30 = vpop.f32.mrb[6].mxu0 }
 0x11c   : > { %v533_v31 = vadd.f32 %v532_v28, %v2487_v61  ;;  %v534_v32 = vpop.f32.mrb[6].mxu1  ;;  %v642_v33 = vmul.f32 0.5, %v471_v25  ;;  %v475_v34 = vadd.f32 %v474_v30, %v2485_v60  ;;  %1986 = vtanh.f32 %v675_v20  ;;  %v476_v35 = vpop.f32.mrb[7].mxu0 }
 0x11d   : > { %v536_v36 = vpop.f32.mrb[7].mxu1  ;;  %v643_v38 = vmul.f32 0.5, %v473_v29  ;;  %v477_v39 = vadd.f32 %v476_v35, %v2487_v61  ;;  %1988 = vtanh.f32 %v676_v23  ;;  %v678_v40 = vmul.f32 0.5, %v531_v27 }
 0x11e   : > { %1990 = vtanh.f32 %v642_v33  ;;  %v645_v41 = vmul.f32 0.5, %v475_v34  ;;  %v535_v42 = vadd.f32 %v534_v32, %v2485_v60  ;;  %v537_v43 = vadd.f32 %v536_v36, %v2487_v61 }
 0x11f   : > { %1992 = vtanh.f32 %v643_v38  ;;  %v646_v44 = vmul.f32 0.5, %v477_v39  ;;  %v679_v45 = vmul.f32 0.5, %v533_v31 }
 0x120   : > { %v1975_v46 = vpop.eup %1974  ;;  %1994 = vtanh.f32 %v645_v41  ;;  %v681_v47 = vmul.f32 0.5, %v535_v42  ;;  %v682_v50 = vmul.f32 0.5, %v537_v43 }
 0x121   : > { %v1977_v48 = vpop.eup %1976  ;;  %v732_v49 = vmul.f32 0.5, %v1975_v46  ;;  %1996 = vtanh.f32 %v646_v44  ;;  %v480_v51 = vpop.f32.mrb[8].mxu0 }
 0x122   : > { %v1798_v52 = vpop.f32.mrb[8].mxu1  ;;  %v1979_v53 = vpop.eup %1978  ;;  %v733_v54 = vmul.f32 0.5, %v1977_v48  ;;  %1998 = vtanh.f32 %v678_v40  ;;  %v481_v55 = vadd.f32 %v480_v51, %v2485_v60 }
 0x123   : > { %v582_v56 = vadd.f32 %v1798_v52, %v2502_v37  ;;  %v482_v57 = vpop.f32.mrb[9].mxu0  ;;  %v573_v58 = vpop.f32.mrb[9].mxu1  ;;  %v2509_v62 = vadd.f32 0.5, %v732_v49  ;;  %v735_v63 = vmul.f32 0.5, %v1979_v53  ;;  %2000 = vtanh.f32 %v679_v45 }
 0x124   : > { %v1981_v59 = vpop.eup %1980  ;;  %v483_v0 = vadd.f32 %v482_v57, %v2487_v61  ;;  %v484_v1 = vpop.f32.mrb[10].mxu0  ;;  %v2512_v4 = vadd.f32 0.5, %v733_v54  ;;  %2002 = vtanh.f32 %v681_v47  ;;  %v648_v6 = vmul.f32 0.5, %v481_v55 }
 0x125   : > { %v1799_v2 = vpop.f32.mrb[10].mxu1  ;;  %v1983_v3 = vpop.eup %1982  ;;  %v736_v5 = vmul.f32 0.5, %v1981_v59  ;;  %v2514_v10 = vadd.f32 0.5, %v735_v63  ;;  %2004 = vtanh.f32 %v682_v50  ;;  %v644_v12 = vmul.f32 0.5, %v582_v56 }
 0x126   : > { %v486_v7 = vpop.f32.mrb[11].mxu0  ;;  %v576_v8 = vpop.f32.mrb[11].mxu1  ;;  %v768_v11 = vmul.f32 0.5, %v1983_v3  ;;  %2006 = vtanh.f32 %v648_v6  ;;  %v649_v16 = vmul.f32 0.5, %v483_v0  ;;  %v574_v24 = vadd.f32 %v573_v58, %v2502_v37 }
 0x127   : > { %v1985_v9 = vpop.eup %1984  ;;  %v2516_v14 = vadd.f32 0.5, %v736_v5  ;;  %v828_v18 = vpack.c.bf16 %v2514_v10, %v2509_v62  ;;  %2008 = vtanh.f32 %v644_v12  ;;  %v485_v28 = vadd.f32 %v484_v1, %v2485_v60 }
 0x128   : > { %v1987_v13 = vpop.eup %1986  ;;  %v769_v15 = vmul.f32 0.5, %v1985_v9  ;;  %v2520_v19 = vadd.f32 0.5, %v768_v11  ;;  %2010 = vtanh.f32 %v649_v16  ;;  %v585_v29 = vadd.f32 %v1799_v2, %v2502_v37 }
 0x129   : > { %v1989_v17 = vpop.eup %1988  ;;  %v771_v20 = vmul.f32 0.5, %v1987_v13  ;;  %v490_v30 = vpop.f32.mrb[12].mxu0  ;;  %v638_v35 = vmul.f32 0.5, %v574_v24  ;;  %v487_v36 = vadd.f32 %v486_v7, %v2487_v61  ;;  %v651_v43 = vmul.f32 0.5, %v485_v28 }
 0x12a   : > { %v1991_v21 = vpop.eup %1990  ;;  %v2522_v22 = vadd.f32 0.5, %v769_v15  ;;  %v772_v23 = vmul.f32 0.5, %v1989_v17  ;;  %v1802_v31 = vpop.f32.mrb[12].mxu1  ;;  %v647_v44 = vmul.f32 0.5, %v585_v29  ;;  %v577_v56 = vadd.f32 %v576_v8, %v2502_v37 }
 0x12b   : > { %v1993_v25 = vpop.eup %1992  ;;  %v738_v26 = vmul.f32 0.5, %v1991_v21  ;;  %v2525_v27 = vadd.f32 0.5, %v771_v20  ;;  %v492_v38 = vpop.f32.mrb[13].mxu0  ;;  %2012 = vtanh.f32 %v638_v35  ;;  %v652_v50 = vmul.f32 0.5, %v487_v36 }
 0x12c   : > { %v1995_v32 = vpop.eup %1994  ;;  %v739_v33 = vmul.f32 0.5, %v1993_v25  ;;  %v2529_v34 = vadd.f32 0.5, %v772_v23  ;;  %v589_v39 = vpop.f32.mrb[13].mxu1  ;;  %2014 = vtanh.f32 %v651_v43  ;;  %v491_v63 = vadd.f32 %v490_v30, %v2485_v60 }
 0x12d   : > { %v1997_v40 = vpop.eup %1996  ;;  %v2532_v41 = vadd.f32 0.5, %v738_v26  ;;  %v741_v42 = vmul.f32 0.5, %v1995_v32  ;;  %v494_v45 = vpop.f32.mrb[14].mxu0  ;;  %2016 = vtanh.f32 %v647_v44  ;;  %v641_v3 = vmul.f32 0.5, %v577_v56 }
 0x12e   : > { %v1803_v46 = vpop.f32.mrb[14].mxu1  ;;  %v1999_v47 = vpop.eup %1998  ;;  %v2534_v48 = vadd.f32 0.5, %v739_v33  ;;  %v742_v49 = vmul.f32 0.5, %v1997_v40  ;;  %2018 = vtanh.f32 %v652_v50  ;;  %v654_v9 = vmul.f32 0.5, %v491_v63 }
 0x12f   : > { %v496_v51 = vpop.f32.mrb[15].mxu0  ;;  %v592_v52 = vpop.f32.mrb[15].mxu1  ;;  %v2536_v54 = vadd.f32 0.5, %v741_v42  ;;  %v774_v55 = vmul.f32 0.5, %v1999_v47  ;;  %v598_v8 = vadd.f32 %v1802_v31, %v2502_v37  ;;  %2020 = vtanh.f32 %v641_v3 }
 0x130   : > { %v2001_v53 = vpop.eup %2000  ;;  %v2539_v58 = vadd.f32 0.5, %v742_v49  ;;  %v493_v15 = vadd.f32 %v492_v38, %v2487_v61  ;;  %2022 = vtanh.f32 %v654_v9  ;;  %v590_v31 = vadd.f32 %v589_v39, %v2502_v37 }
 0x131   : > { %v2003_v57 = vpop.eup %2002  ;;  %v775_v59 = vmul.f32 0.5, %v2001_v53  ;;  %v2542_v1 = vadd.f32 0.5, %v774_v55  ;;  %v500_v16 = vpop.f32.mrb[16].mxu0  ;;  %v656_v24 = vmul.f32 0.5, %v598_v8  ;;  %v829_v36 = vpack.c.bf16 %v2516_v14, %v2512_v4 }
 0x132   : > { %v2005_v0 = vpop.eup %2004  ;;  %v777_v2 = vmul.f32 0.5, %v2003_v57  ;;  %v2550_v17 = vpop.f32.mrb[16].mxu1  ;;  %v655_v30 = vmul.f32 0.5, %v493_v15  ;;  %v495_v38 = vadd.f32 %v494_v45, %v2485_v60  ;;  %v650_v44 = vmul.f32 0.5, %v590_v31 }
 0x133   : > { %v2007_v5 = vpop.eup %2006  ;;  %v2544_v6 = vadd.f32 0.5, %v775_v59  ;;  %v778_v7 = vmul.f32 0.5, %v2005_v0  ;;  %v502_v25 = vpop.f32.mrb[17].mxu0  ;;  %2024 = vtanh.f32 %v656_v24  ;;  %v601_v39 = vadd.f32 %v1803_v46, %v2502_v37  ;;  %1083 = vmatprep.mubr.bf16.mxu1 %v829_v36 }
 0x134   : > { %v2009_v11 = vpop.eup %2008  ;;  %v2547_v12 = vadd.f32 0.5, %v777_v2  ;;  %v744_v13 = vmul.f32 0.5, %v2007_v5  ;;  %v2554_v26 = vpop.f32.mrb[17].mxu1  ;;  %2026 = vtanh.f32 %v655_v30  ;;  %v657_v49 = vmul.f32 0.5, %v495_v38  ;;  %1084 = vmatmul.mubr.bf16.vlgmr.msra.gmra.mrb[24].mxu1 %v828_v18 }
 0x135   : > { %v2011_v20 = vpop.eup %2010  ;;  %v2552_v21 = vadd.f32 0.5, %v778_v7  ;;  %v740_v23 = vmul.f32 0.5, %v2009_v11  ;;  %v504_v32 = vpop.f32.mrb[18].mxu0  ;;  %v497_v50 = vadd.f32 %v496_v51, %v2487_v61  ;;  %v593_v53 = vadd.f32 %v592_v52, %v2502_v37 }
 0x136   : > { %v2556_v28 = vadd.f32 0.5, %v744_v13  ;;  %v745_v29 = vmul.f32 0.5, %v2011_v20  ;;  %v2559_v33 = vpop.f32.mrb[18].mxu1  ;;  %v506_v40 = vpop.f32.mrb[19].mxu0  ;;  %v501_v4 = vadd.f32 %v500_v16, %v2485_v60  ;;  %2028 = vtanh.f32 %v650_v44 }
 0x137   : > { %v2561_v35 = vadd.f32 0.5, %v740_v23  ;;  %v2566_v42 = vpop.f32.mrb[19].mxu1  ;;  %v2013_v47 = vpop.eup %2012  ;;  %v659_v55 = vmul.f32 0.5, %v601_v39  ;;  %v503_v56 = vadd.f32 %v502_v25, %v2487_v61  ;;  %2030 = vtanh.f32 %v657_v49 }
 0x138   : > { %v2568_v43 = vadd.f32 0.5, %v745_v29  ;;  %v2015_v14 = vpop.eup %2014  ;;  %v734_v45 = vmul.f32 0.5, %v2013_v47  ;;  %v658_v59 = vmul.f32 0.5, %v497_v50  ;;  %v653_v63 = vmul.f32 0.5, %v593_v53 }
 0x139   : > { %v2017_v46 = vpop.eup %2016  ;;  %v747_v57 = vmul.f32 0.5, %v2015_v14  ;;  %2032 = vtanh.f32 %v659_v55  ;;  %v660_v2 = vmul.f32 0.5, %v501_v4  ;;  %v510_v3 = vpop.f32.mrb[20].mxu0  ;;  %v661_v10 = vmul.f32 0.5, %v503_v56 }
 0x13a   : > { %v2019_v51 = vpop.eup %2018  ;;  %v2578_v0 = vadd.f32 0.5, %v734_v45  ;;  %v743_v52 = vmul.f32 0.5, %v2017_v46  ;;  %v2580_v5 = vpop.f32.mrb[20].mxu1  ;;  %2034 = vtanh.f32 %v658_v59  ;;  %v832_v13 = vpack.c.bf16 %v2539_v58, %v2534_v48 }
 0x13b   : > { %v2582_v7 = vadd.f32 0.5, %v747_v57  ;;  %v748_v62 = vmul.f32 0.5, %v2019_v51  ;;  %v512_v18 = vpop.f32.mrb[21].mxu0  ;;  %v2584_v9 = vpop.f32.mrb[21].mxu1  ;;  %2036 = vtanh.f32 %v653_v63  ;;  %v505_v15 = vadd.f32 %v504_v32, %v2485_v60 }
 0x13c   : > { %v2021_v8 = vpop.eup %2020  ;;  %v2586_v11 = vadd.f32 0.5, %v743_v52  ;;  %v2591_v16 = vpop.f32.mrb[22].mxu0  ;;  %2038 = vtanh.f32 %v660_v2  ;;  %v831_v29 = vpack.c.bf16 %v2536_v54, %v2532_v41  ;;  %1091 = vmatprep.mubr.bf16.mxu1 %v832_v13  ;;  %v507_v44 = vadd.f32 %v506_v40, %v2487_v61 }
 0x13d   : > { %v2593_v20 = vpop.f32.mrb[22].mxu1  ;;  %v2023_v23 = vpop.eup %2022  ;;  %v796_v24 = vadd.f32 0.5, %v748_v62  ;;  %v737_v25 = vmul.f32 0.5, %v2021_v8  ;;  %2040 = vtanh.f32 %v661_v10  ;;  %v663_v32 = vmul.f32 0.5, %v505_v15 }
 0x13e   : > { %v2597_v30 = vpop.f32.mrb[23].mxu0  ;;  %v2599_v31 = vpop.f32.mrb[23].mxu1  ;;  %v833_v48 = vpack.c.bf16 %v2586_v11, %v2561_v35  ;;  %v750_v58 = vmul.f32 0.5, %v2023_v23  ;;  %v614_v39 = vadd.f32 %v2550_v17, %v2502_v37  ;;  %v606_v41 = vadd.f32 %v2554_v26, %v2502_v37  ;;  %1092 = vmatmul.mubr.bf16.gmra.mrb[28].mxu1 %v831_v29 }
 0x13f   : > { %v2025_v36 = vpop.eup %2024  ;;  %v785_v38 = vadd.f32 0.5, %v737_v25  ;;  %2042 = vtanh.f32 %v663_v32  ;;  %v617_v50 = vadd.f32 %v2559_v33, %v2502_v37  ;;  %v664_v4 = vmul.f32 0.5, %v507_v44 }
 0x140   : > { %v2027_v54 = vpop.eup %2026  ;;  %v2608_v47 = vadd.f32 0.5, %v750_v58  ;;  %v752_v49 = vmul.f32 0.5, %v2025_v36  ;;  %v668_v14 = vmul.f32 0.5, %v614_v39  ;;  %v662_v45 = vmul.f32 0.5, %v606_v41 }
 0x141   : > { %v751_v53 = vmul.f32 0.5, %v2027_v54  ;;  %v2029_v40 = vpop.eup %2028  ;;  %v671_v17 = vmul.f32 0.5, %v617_v50  ;;  %v609_v26 = vadd.f32 %v2566_v42, %v2502_v37  ;;  %v511_v56 = vadd.f32 %v510_v3, %v2485_v60 }
 0x142   : > { %v2612_v55 = vadd.f32 0.5, %v752_v49  ;;  %v2031_v46 = vpop.eup %2030  ;;  %v746_v59 = vmul.f32 0.5, %v2029_v40  ;;  %2044 = vtanh.f32 %v664_v4  ;;  %v513_v63 = vadd.f32 %v512_v18, %v2487_v61 }
 0x143   : > { %v799_v57 = vadd.f32 0.5, %v751_v53  ;;  %v2033_v33 = vpop.eup %2032  ;;  %v753_v51 = vmul.f32 0.5, %v2031_v46  ;;  %2046 = vtanh.f32 %v668_v14  ;;  %v665_v52 = vmul.f32 0.5, %v609_v26 }
 0x144   : > { %v666_v2 = vmul.f32 0.5, %v511_v56  ;;  %v2035_v62 = vpop.eup %2034  ;;  %v794_v10 = vadd.f32 0.5, %v746_v59  ;;  %v755_v8 = vmul.f32 0.5, %v2033_v33  ;;  %2048 = vtanh.f32 %v662_v45 }
 0x145   : > { %v667_v13 = vmul.f32 0.5, %v513_v63  ;;  %v2037_v15 = vpop.eup %2036  ;;  %v2618_v42 = vadd.f32 0.5, %v753_v51  ;;  %v754_v3 = vmul.f32 0.5, %v2035_v62  ;;  %2050 = vtanh.f32 %v671_v17 }
 0x146   : > { %v835_v23 = vpack.c.bf16 %v796_v24, %v2568_v43  ;;  %v2039_v25 = vpop.eup %2038  ;;  %v803_v29 = vadd.f32 0.5, %v755_v8  ;;  %v749_v18 = vmul.f32 0.5, %v2037_v15  ;;  %2052 = vtanh.f32 %v665_v52 }
 0x147   : > { %v830_v58 = vpack.c.bf16 %v785_v38, %v2578_v0  ;;  %v2041_v32 = vpop.eup %2040  ;;  %v802_v36 = vadd.f32 0.5, %v754_v3  ;;  %v756_v44 = vmul.f32 0.5, %v2039_v25  ;;  %2054 = vtanh.f32 %v666_v2 }
 0x148   : > { %1099 = vmatprep.mubr.bf16.mxu1 %v835_v23  ;;  %v515_v39 = vadd.f32 %v2591_v16, %v2485_v60  ;;  %v797_v41 = vadd.f32 0.5, %v749_v18  ;;  %v757_v54 = vmul.f32 0.5, %v2041_v32  ;;  %2056 = vtanh.f32 %v667_v13 }
 0x149   : > { %1828 = vmatprep.mubr.bf16.mxu0 %v830_v58  ;;  %v834_v43 = vpack.c.bf16 %v2582_v7, %v2556_v28  ;;  %v2043_v24 = vpop.eup %2042  ;;  %v2626_v49 = vadd.f32 0.5, %v756_v44  ;;  %v517_v0 = vadd.f32 %v2597_v30, %v2487_v61  ;;  %v838_v38 = vpack.c.bf16 %v802_v36, %v799_v57 }
 0x14a   : > { %v669_v50 = vmul.f32 0.5, %v515_v39  ;;  %1829 = vmatmul.mubr.bf16.vlgmr.msra.gmra.mrb[24].mxu0 %v833_v48  ;;  %v805_v60 = vadd.f32 0.5, %v757_v54  ;;  %v759_v16 = vmul.f32 0.5, %v2043_v24  ;;  %v836_v53 = vpack.c.bf16 %v797_v41, %v794_v10 }
 0x14b   : > { %1100 = vmatmul.mubr.bf16.gmra.mrb[32].mxu1 %v834_v43  ;;  %v837_v4 = vpack.c.bf16 %v2618_v42, %v2608_v47  ;;  %v670_v28 = vmul.f32 0.5, %v517_v0  ;;  %v839_v7 = vpack.c.bf16 %v803_v29, %v2612_v55  ;;  %v630_v35 = vadd.f32 %v2580_v5, %v2502_v37 }
 0x14c   : > { %2058 = vtanh.f32 %v669_v50  ;;  %1107 = vmatprep.mubr.bf16.mxu1 %v838_v38  ;;  %v2045_v11 = vpop.eup %2044  ;;  %v807_v48 = vadd.f32 0.5, %v759_v16  ;;  %1832 = vmatprep.mubr.bf16.mxu0 %v836_v53  ;;  %v622_v61 = vadd.f32 %v2584_v9, %v2502_v37  ;;  %v633_v30 = vadd.f32 %v2593_v20, %v2502_v37  ;;  %v1966_v53 = vld [vmem:[%s2808_s5] sm:$0xff]  }
 0x14d   : > { %v625_v47 = vadd.f32 %v2599_v31, %v2502_v37  ;;  %v2047_v14 = vpop.eup %2046  ;;  %v760_v45 = vmul.f32 0.5, %v2045_v11  ;;  %2060 = vtanh.f32 %v670_v28  ;;  %v680_v40 = vmul.f32 0.5, %v630_v35  ;;  %1844 = vmatprep.subr.bf16.mxu0 %v1966_v53  ;;  %v1968_v28 = vld [vmem:[%s2808_s5 + $0x10] sm:$0xff]   ;;  %v1970_v35 = vld [vmem:[%s2808_s5 + $0x20] sm:$0xff]   ;;  %v1971_v11 = vld [vmem:[%s2808_s5 + $0x28] sm:$0xff]  }
 0x14e   : > { %v847_v55 = vpack.c.bf16 %v2529_v34, %v2522_v22  ;;  %v2049_v5 = vpop.eup %2048  ;;  %v764_v17 = vmul.f32 0.5, %v2047_v14  ;;  %v674_v26 = vmul.f32 0.5, %v622_v61  ;;  %v683_v56 = vmul.f32 0.5, %v633_v30  ;;  %1845 = vmatpush3.bf16.msra.mxu0 %v1966_v53  ;;  %v1973_v61 = vld [vmem:[%s2808_s5 + $0x38] sm:$0xff]  }
 0x14f   : > { %v677_v46 = vmul.f32 0.5, %v625_v47  ;;  %v2051_v57 = vpop.eup %2050  ;;  %v808_v9 = vadd.f32 0.5, %v760_v45  ;;  %v758_v59 = vmul.f32 0.5, %v2049_v5  ;;  %2062 = vtanh.f32 %v680_v40 }
 0x150   : > { %v840_v20 = vpack.c.bf16 %v807_v48, %v2626_v49  ;;  %v2053_v63 = vpop.eup %2052  ;;  %v812_v37 = vadd.f32 0.5, %v764_v17  ;;  %v767_v31 = vmul.f32 0.5, %v2051_v57  ;;  %2064 = vtanh.f32 %v674_v26  ;;  %v1972_v48 = vld [vmem:[%s2808_s5 + $0x30] sm:$0xff]  }
 0x151   : > { %v846_v33 = vpack.c.bf16 %v2525_v27, %v2520_v19  ;;  %v2055_v51 = vpop.eup %2054  ;;  %v806_v22 = vadd.f32 0.5, %v758_v59  ;;  %v761_v34 = vmul.f32 0.5, %v2053_v63  ;;  %2066 = vtanh.f32 %v683_v56 }
 0x152   : > { %1833 = vmatmul.mubr.bf16.gmra.mrb[28].mxu0 %v839_v7  ;;  %v841_v52 = vpack.c.bf16 %v808_v9, %v805_v60  ;;  %v2057_v2 = vpop.eup %2056  ;;  %v815_v62 = vadd.f32 0.5, %v767_v31  ;;  %2068 = vtanh.f32 %v677_v46  ;;  %v850_v10 = vpack.c.bf16 %v2552_v21, %v2544_v6  ;;  %v1969_v7 = vld [vmem:[%s2808_s5 + $0x18] sm:$0xff]   ;;  %v2680_v9 = vld [vmem:[%s2807_s4] ss:$0 sm:$0xff] }
 0x153   : > { %1108 = vmatmul.mubr.bf16.gmra.mrb[36].mxu1 %v837_v4  ;;  %v809_v8 = vadd.f32 0.5, %v761_v34  ;;  %v849_v13 = vpack.c.bf16 %v2547_v12, %v2542_v1  ;;  %v762_v15 = vmul.f32 0.5, %v2055_v51  ;;  %v763_v3 = vmul.f32 0.5, %v2057_v2  ;;  %v1967_v4 = vld [vmem:[%s2808_s5 + $0x8] sm:$0xff]  }
 0x154   : > { %1115 = vmatprep.mubr.bf16.mxu1 %v841_v52  ;;  %v845_v19 = vpack.c.bf16 %v815_v62, %v812_v37  ;;  %1846 = vmatprep.subr.bf16.mxu0 %v1967_v4 }
 0x155   : > { %v842_v42 = vpack.c.bf16 %v809_v8, %v806_v22  ;;  %v810_v29 = vadd.f32 0.5, %v762_v15  ;;  %v811_v6 = vadd.f32 0.5, %v763_v3  ;;  %1847 = vmatpush3.bf16.msra.mxu0 %v1967_v4 }
 0x156   : > { %v2059_v27 = vpop.eup %2058  ;;  %1848 = vmatprep.subr.bf16.mxu0 %v1968_v28 }
 0x157   : > { %v765_v23 = vmul.f32 0.5, %v2059_v27  ;;  %v2061_v25 = vpop.eup %2060  ;;  %1836 = vmatprep.mubr.bf16.mxu0 %v842_v42 }
 0x158   : > { %v766_v58 = vmul.f32 0.5, %v2061_v25 }
 0x159   : > { %v813_v18 = vadd.f32 0.5, %v765_v23  ;;  %v2063_v32 = vpop.eup %2062  ;;  %1849 = vmatpush3.bf16.msra.mxu0 %v1968_v28 }
 0x15a   : > { %1837 = vmatmul.mubr.bf16.gmra.mrb[32].mxu0 %v845_v19  ;;  %v2065_v36 = vpop.eup %2064  ;;  %v814_v21 = vadd.f32 0.5, %v766_v58  ;;  %v776_v44 = vmul.f32 0.5, %v2063_v32  ;;  %1850 = vmatprep.subr.bf16.mxu0 %v1969_v7 }
 0x15b   : > { %1116 = vmatmul.mubr.bf16.gmra.mrb[40].mxu1 %v840_v20  ;;  %v843_v39 = vpack.c.bf16 %v813_v18, %v810_v29  ;;  %v2067_v1 = vpop.eup %2066  ;;  %v770_v12 = vmul.f32 0.5, %v2065_v36 }
 0x15c   : > { %v2069_v41 = vpop.eup %2068  ;;  %v824_v54 = vadd.f32 0.5, %v776_v44  ;;  %v779_v43 = vmul.f32 0.5, %v2067_v1  ;;  %v844_v24 = vpack.c.bf16 %v814_v21, %v811_v6 }
 0x15d   : > { %v818_v49 = vadd.f32 0.5, %v770_v12  ;;  %v773_v50 = vmul.f32 0.5, %v2069_v41  ;;  %1851 = vmatpush3.bf16.msra.mxu0 %v1969_v7 }
 0x15e   : > { %v827_v0 = vadd.f32 0.5, %v779_v43  ;;  %1123 = vmatprep.mubr.bf16.mxu1 %v844_v24  ;;  %1852 = vmatprep.subr.bf16.mxu0 %v1970_v35 }
 0x15f   : > { %v821_v38 = vadd.f32 0.5, %v773_v50 }
 0x160   : > { %v851_v60 = vpack.c.bf16 %v827_v0, %v824_v54 }
 0x161   : > { %v848_v16 = vpack.c.bf16 %v821_v38, %v818_v49  ;;  %1853 = vmatpush3.bf16.msra.mxu0 %v1970_v35 }
 0x162   : > { %1854 = vmatprep.subr.bf16.mxu0 %v1971_v11 }
 0x163   : > { %1124 = vmatmul.mubr.bf16.gmra.mrb[44].mxu1 %v843_v39  ;;  %1840 = vmatprep.mubr.bf16.mxu0 %v848_v16 }
 0x164   : > { %1131 = vmatprep.mubr.bf16.mxu1 %v847_v55  ;;  %1841 = vmatmul.mubr.bf16.gmra.mrb[36].mxu0 %v851_v60 }
 0x165   : > { %1855 = vmatpush3.bf16.msra.mxu0 %v1971_v11 }
 0x166   : > { %1856 = vmatprep.subr.bf16.mxu0 %v1972_v48 }
 0x169   : > { %1857 = vmatpush3.bf16.msra.mxu0 %v1972_v48 }
 0x16a   : > { %1858 = vmatprep.subr.bf16.mxu0 %v1973_v61 }
 0x16b   : > { %1132 = vmatmul.mubr.bf16.gmra.mrb[48].mxu1 %v846_v33 }
 0x16c   : > { %1139 = vmatprep.mubr.bf16.mxu1 %v850_v10 }
 0x16d   : > { %1859 = vmatpush3.bf16.msra.mxu0 %v1973_v61 }
 0x173   : > { %1140 = vmatmul.mubr.bf16.gmra.mrb[52].mxu1 %v849_v13 }
 0x207   : > { %v1712_v30 = vpop.f32.mrb[24].mxu1 }
 0x208   : > { %v1713_v47 = vpop.f32.mrb[25].mxu1 }
 0x209   : > { %v1714_v14 = vadd.f32 %v1713_v47, %v1712_v30  ;;  %v1715_v45 = vpop.f32.mrb[26].mxu1 }
 0x20a   : > { %v1716_v40 = vpop.f32.mrb[27].mxu1 }
 0x20b   : > { %v1717_v55 = vadd.f32 %v1716_v40, %v1715_v45  ;;  %v1086_v63 = vadd.f32 %v1714_v14, %v2680_v9 }
 0x20d   : > { %v1089_v2 = vadd.f32 %v1717_v55, %v2680_v9 }
 0x211   : > { %v1718_v5 = vpop.f32.mrb[28].mxu1 }
 0x212   : > { %v1719_v17 = vpop.f32.mrb[29].mxu1 }
 0x213   : > { %v1720_v26 = vadd.f32 %v1719_v17, %v1718_v5  ;;  %v1721_v56 = vpop.f32.mrb[30].mxu1 }
 0x214   : > { %v1722_v46 = vpop.f32.mrb[31].mxu1 }
 0x215   : > { %v1723_v57 = vadd.f32 %v1722_v46, %v1721_v56  ;;  %v1094_v59 = vadd.f32 %v1720_v26, %v2680_v9 }
 0x217   : > { %v1097_v51 = vadd.f32 %v1723_v57, %v2680_v9 }
 0x21d   : > { %v1830_v20 = vpop.f32.mrb[24].mxu0 }
 0x21e   : > { %v1724_v37 = vpop.f32.mrb[32].mxu1  ;;  %v1191_v31 = vadd.f32 %v1830_v20, %v1094_v59  ;;  %v1182_v33 = vpop.f32.mrb[25].mxu0 }
 0x21f   : > { %v1725_v22 = vpop.f32.mrb[33].mxu1  ;;  %v1183_v34 = vadd.f32 %v1182_v33, %v1086_v63  ;;  %v1831_v52 = vpop.f32.mrb[26].mxu0 }
 0x220   : > { %v1247_v62 = vmul.f32 0.5, %v1191_v31  ;;  %v1726_v10 = vadd.f32 %v1725_v22, %v1724_v37  ;;  %v1727_v8 = vpop.f32.mrb[34].mxu1  ;;  %v1194_v13 = vadd.f32 %v1831_v52, %v1097_v51  ;;  %v1185_v15 = vpop.f32.mrb[27].mxu0 }
 0x221   : > { %v1245_v19 = vmul.f32 0.5, %v1183_v34  ;;  %v1728_v27 = vpop.f32.mrb[35].mxu1  ;;  %v1186_v42 = vadd.f32 %v1185_v15, %v1089_v2 }
 0x222   : > { %2070 = vtanh.f32 %v1247_v62  ;;  %v1248_v3 = vmul.f32 0.5, %v1194_v13  ;;  %v1729_v23 = vadd.f32 %v1728_v27, %v1727_v8  ;;  %v1102_v18 = vadd.f32 %v1726_v10, %v2680_v9 }
 0x223   : > { %2072 = vtanh.f32 %v1245_v19  ;;  %v1246_v25 = vmul.f32 0.5, %v1186_v42 }
 0x224   : > { %2074 = vtanh.f32 %v1248_v3  ;;  %v1105_v44 = vadd.f32 %v1729_v23, %v2680_v9 }
 0x225   : > { %2076 = vtanh.f32 %v1246_v25  ;;  %v1834_v29 = vpop.f32.mrb[28].mxu0 }
 0x226   : > { %v1730_v58 = vpop.f32.mrb[36].mxu1  ;;  %v1198_v32 = vpop.f32.mrb[29].mxu0 }
 0x227   : > { %v1731_v36 = vpop.f32.mrb[37].mxu1  ;;  %v1199_v6 = vadd.f32 %v1198_v32, %v1102_v18  ;;  %v1835_v21 = vpop.f32.mrb[30].mxu0 }
 0x228   : > { %v1732_v39 = vadd.f32 %v1731_v36, %v1730_v58  ;;  %v1733_v1 = vpop.f32.mrb[38].mxu1  ;;  %v1201_v12 = vpop.f32.mrb[31].mxu0 }
 0x229   : > { %v1249_v41 = vmul.f32 0.5, %v1199_v6  ;;  %v1734_v54 = vpop.f32.mrb[39].mxu1  ;;  %v1202_v43 = vadd.f32 %v1201_v12, %v1105_v44 }
 0x22a   : > { %v1110_v24 = vadd.f32 %v1732_v39, %v2680_v9  ;;  %v1735_v49 = vadd.f32 %v1734_v54, %v1733_v1 }
 0x22b   : > { %2078 = vtanh.f32 %v1249_v41  ;;  %v1250_v50 = vmul.f32 0.5, %v1202_v43 }
 0x22c   : > { %v2071_v0 = vpop.eup %2070  ;;  %v1207_v38 = vadd.f32 %v1834_v29, %v1110_v24  ;;  %v1113_v60 = vadd.f32 %v1735_v49, %v2680_v9 }
 0x22d   : > { %v2073_v16 = vpop.eup %2072  ;;  %v1279_v53 = vmul.f32 0.5, %v2071_v0  ;;  %2080 = vtanh.f32 %v1250_v50  ;;  %v1838_v4 = vpop.f32.mrb[32].mxu0 }
 0x22e   : > { %v2075_v28 = vpop.eup %2074  ;;  %v1277_v7 = vmul.f32 0.5, %v2073_v16  ;;  %v1251_v35 = vmul.f32 0.5, %v1207_v38  ;;  %v1210_v11 = vadd.f32 %v1835_v21, %v1113_v60  ;;  %v1736_v48 = vpop.f32.mrb[40].mxu1 }
 0x22f   : > { %v1214_v61 = vpop.f32.mrb[33].mxu0  ;;  %v2077_v30 = vpop.eup %2076  ;;  %v1280_v47 = vmul.f32 0.5, %v2075_v28  ;;  %v1295_v26 = vadd.f32 0.5, %v1279_v53 }
 0x230   : > { %v1737_v14 = vpop.f32.mrb[41].mxu1  ;;  %v1839_v45 = vpop.f32.mrb[34].mxu0  ;;  %v1278_v40 = vmul.f32 0.5, %v2077_v30  ;;  %2082 = vtanh.f32 %v1251_v35  ;;  %v1252_v55 = vmul.f32 0.5, %v1210_v11  ;;  %v1293_v59 = vadd.f32 0.5, %v1277_v7 }
 0x231   : > { %v1739_v5 = vpop.f32.mrb[42].mxu1  ;;  %v1217_v17 = vpop.f32.mrb[35].mxu0  ;;  %v1296_v56 = vadd.f32 0.5, %v1280_v47  ;;  %v1738_v46 = vadd.f32 %v1737_v14, %v1736_v48 }
 0x232   : > { %v1740_v57 = vpop.f32.mrb[43].mxu1  ;;  %v1294_v20 = vadd.f32 0.5, %v1278_v40  ;;  %2084 = vtanh.f32 %v1252_v55 }
 0x233   : > { %v1741_v63 = vadd.f32 %v1740_v57, %v1739_v5  ;;  %v1310_v37 = vpack.c.bf16 %v1296_v56, %v1295_v26  ;;  %v1118_v31 = vadd.f32 %v1738_v46, %v2680_v9 }
 0x234   : > { %v1309_v51 = vpack.c.bf16 %v1294_v20, %v1293_v59 }
 0x235   : > { %v1121_v33 = vadd.f32 %v1741_v63, %v2680_v9  ;;  %v2079_v22 = vpop.eup %2078  ;;  %v1215_v34 = vadd.f32 %v1214_v61, %v1118_v31 }
 0x236   : > { %v1281_v52 = vmul.f32 0.5, %v2079_v22  ;;  %v1742_v62 = vpop.f32.mrb[44].mxu1  ;;  %1860 = vmatprep.mubr.bf16.mxu0 %v1309_v51 }
 0x237   : > { %v1218_v2 = vadd.f32 %v1217_v17, %v1121_v33  ;;  %v2081_v10 = vpop.eup %2080  ;;  %v1253_v8 = vmul.f32 0.5, %v1215_v34  ;;  %v1743_v13 = vpop.f32.mrb[45].mxu1  ;;  %1861 = vmatmul.mubr.bf16.vlgmr.msra.gmra.mrb[40].mxu0 %v1310_v37 }
 0x238   : > { %v1282_v15 = vmul.f32 0.5, %v2081_v10  ;;  %v1744_v27 = vadd.f32 %v1743_v13, %v1742_v62  ;;  %v1745_v42 = vpop.f32.mrb[46].mxu1  ;;  %v1842_v3 = vpop.f32.mrb[36].mxu0  ;;  %v1297_v23 = vadd.f32 0.5, %v1281_v52 }
 0x239   : > { %v1254_v19 = vmul.f32 0.5, %v1218_v2  ;;  %2086 = vtanh.f32 %v1253_v8  ;;  %v1746_v25 = vpop.f32.mrb[47].mxu1  ;;  %v1230_v29 = vpop.f32.mrb[37].mxu0 }
 0x23a   : > { %v2083_v18 = vpop.eup %2082  ;;  %v1298_v58 = vadd.f32 0.5, %v1282_v15  ;;  %v1126_v32 = vadd.f32 %v1744_v27, %v2680_v9  ;;  %v1747_v36 = vadd.f32 %v1746_v25, %v1745_v42  ;;  %v1843_v6 = vpop.f32.mrb[38].mxu0 }
 0x23b   : > { %2088 = vtanh.f32 %v1254_v19  ;;  %v1283_v21 = vmul.f32 0.5, %v2083_v18  ;;  %v1233_v44 = vpop.f32.mrb[39].mxu0 }
 0x23c   : > { %v2085_v39 = vpop.eup %2084  ;;  %v1223_v1 = vadd.f32 %v1838_v4, %v1126_v32  ;;  %v1129_v12 = vadd.f32 %v1747_v36, %v2680_v9  ;;  %v1311_v41 = vpack.c.bf16 %v1298_v58, %v1297_v23 }
 0x23d   : > { %v1284_v54 = vmul.f32 0.5, %v2085_v39  ;;  %v1299_v0 = vadd.f32 0.5, %v1283_v21 }
 0x23e   : > { %v1255_v43 = vmul.f32 0.5, %v1223_v1  ;;  %v1226_v24 = vadd.f32 %v1839_v45, %v1129_v12  ;;  %v1748_v49 = vpop.f32.mrb[48].mxu1  ;;  %1864 = vmatprep.mubr.bf16.mxu0 %v1311_v41 }
 0x23f   : > { %v1749_v50 = vpop.f32.mrb[49].mxu1  ;;  %v1300_v38 = vadd.f32 0.5, %v1284_v54 }
 0x240   : > { %2090 = vtanh.f32 %v1255_v43  ;;  %v1256_v60 = vmul.f32 0.5, %v1226_v24  ;;  %v1750_v16 = vadd.f32 %v1749_v50, %v1748_v49  ;;  %v1751_v53 = vpop.f32.mrb[50].mxu1 }
 0x241   : > { %v1752_v28 = vpop.f32.mrb[51].mxu1  ;;  %v1312_v7 = vpack.c.bf16 %v1300_v38, %v1299_v0 }
 0x242   : > { %2092 = vtanh.f32 %v1256_v60  ;;  %v1753_v35 = vadd.f32 %v1752_v28, %v1751_v53  ;;  %v1134_v4 = vadd.f32 %v1750_v16, %v2680_v9 }
 0x243   : > { %v2087_v11 = vpop.eup %2086  ;;  %1865 = vmatmul.mubr.bf16.gmra.mrb[44].mxu0 %v1312_v7 }
 0x244   : > { %v1285_v61 = vmul.f32 0.5, %v2087_v11  ;;  %v1231_v30 = vadd.f32 %v1230_v29, %v1134_v4  ;;  %v1137_v47 = vadd.f32 %v1753_v35, %v2680_v9 }
 0x245   : > { %v2089_v48 = vpop.eup %2088 }
 0x246   : > { %v1286_v14 = vmul.f32 0.5, %v2089_v48  ;;  %v1257_v45 = vmul.f32 0.5, %v1231_v30  ;;  %v1234_v40 = vadd.f32 %v1233_v44, %v1137_v47  ;;  %v1754_v55 = vpop.f32.mrb[52].mxu1  ;;  %v1301_v5 = vadd.f32 0.5, %v1285_v61  ;;  %v2702_v44 = vld [vmem:[%s2809_s6] ss:$0 sm:$0xff] }
 0x247   : > { %v1755_v26 = vpop.f32.mrb[53].mxu1 }
 0x248   : > { %v1302_v17 = vadd.f32 0.5, %v1286_v14  ;;  %2094 = vtanh.f32 %v1257_v45  ;;  %v1258_v56 = vmul.f32 0.5, %v1234_v40  ;;  %v1756_v46 = vadd.f32 %v1755_v26, %v1754_v55  ;;  %v1757_v57 = vpop.f32.mrb[54].mxu1 }
 0x249   : > { %v1758_v59 = vpop.f32.mrb[55].mxu1 }
 0x24a   : > { %v1313_v20 = vpack.c.bf16 %v1302_v17, %v1301_v5  ;;  %v2091_v63 = vpop.eup %2090  ;;  %2096 = vtanh.f32 %v1258_v56  ;;  %v1142_v37 = vadd.f32 %v1756_v46, %v2680_v9  ;;  %v1759_v31 = vadd.f32 %v1758_v59, %v1757_v57 }
 0x24b   : > { %v1287_v33 = vmul.f32 0.5, %v2091_v63 }
 0x24c   : > { %1868 = vmatprep.mubr.bf16.mxu0 %v1313_v20  ;;  %v2093_v51 = vpop.eup %2092  ;;  %v1239_v22 = vadd.f32 %v1842_v3, %v1142_v37  ;;  %v1145_v34 = vadd.f32 %v1759_v31, %v2680_v9 }
 0x24d   : > { %v1288_v52 = vmul.f32 0.5, %v2093_v51  ;;  %v1303_v10 = vadd.f32 0.5, %v1287_v33 }
 0x24e   : > { %v1259_v2 = vmul.f32 0.5, %v1239_v22  ;;  %v1242_v62 = vadd.f32 %v1843_v6, %v1145_v34 }
 0x24f   : > { %v1304_v8 = vadd.f32 0.5, %v1288_v52 }
 0x250   : > { %2098 = vtanh.f32 %v1259_v2  ;;  %v1260_v13 = vmul.f32 0.5, %v1242_v62 }
 0x251   : > { %v1314_v15 = vpack.c.bf16 %v1304_v8, %v1303_v10 }
 0x252   : > { %v2095_v19 = vpop.eup %2094  ;;  %2100 = vtanh.f32 %v1260_v13 }
 0x253   : > { %v1289_v27 = vmul.f32 0.5, %v2095_v19  ;;  %1869 = vmatmul.mubr.bf16.gmra.mrb[48].mxu0 %v1314_v15 }
 0x254   : > { %v2097_v42 = vpop.eup %2096 }
 0x255   : > { %v1290_v23 = vmul.f32 0.5, %v2097_v42  ;;  %v1305_v25 = vadd.f32 0.5, %v1289_v27 }
 0x257   : > { %v1306_v29 = vadd.f32 0.5, %v1290_v23 }
 0x259   : > { %v1315_v3 = vpack.c.bf16 %v1306_v29, %v1305_v25 }
 0x25a   : > { %v2099_v18 = vpop.eup %2098 }
 0x25b   : > { %1872 = vmatprep.mubr.bf16.mxu0 %v1315_v3  ;;  %v1291_v9 = vmul.f32 0.5, %v2099_v18 }
 0x25c   : > { %v2101_v58 = vpop.eup %2100 }
 0x25d   : > { %v1292_v32 = vmul.f32 0.5, %v2101_v58  ;;  %v1307_v36 = vadd.f32 0.5, %v1291_v9 }
 0x25f   : > { %v1308_v6 = vadd.f32 0.5, %v1292_v32 }
 0x261   : > { %v1316_v21 = vpack.c.bf16 %v1308_v6, %v1307_v36 }
 0x263   : > { %1873 = vmatmul.mubr.bf16.gmra.mrb[52].mxu0 %v1316_v21 }
 0x30a   : > { %v1862_v39 = vpop.f32.mrb[40].mxu0 }
 0x30b   : > { %v1431_v1 = vadd.f32 %v1862_v39, %v2702_v44  ;;  %v1422_v12 = vpop.f32.mrb[41].mxu0 }
 0x30c   : > { %v1423_v41 = vadd.f32 %v2702_v44, %v1422_v12  ;;  %v1863_v54 = vpop.f32.mrb[42].mxu0 }
 0x30d   : > { %2102 = vtanh.f32 %v1431_v1  ;;  %v1434_v43 = vadd.f32 %v1863_v54, %v2702_v44  ;;  %v1425_v24 = vpop.f32.mrb[43].mxu0 }
 0x30e   : > { %2104 = vtanh.f32 %v1423_v41  ;;  %v1426_v49 = vadd.f32 %v2702_v44, %v1425_v24 }
 0x30f   : > { %2106 = vtanh.f32 %v1434_v43 }
 0x310   : > { %2108 = vtanh.f32 %v1426_v49 }
 0x316   : > { %v1866_v50 = vpop.f32.mrb[44].mxu0 }
 0x317   : > { %v2103_v0 = vpop.eup %2102  ;;  %v1447_v38 = vadd.f32 %v1866_v50, %v2702_v44  ;;  %v1438_v60 = vpop.f32.mrb[45].mxu0 }
 0x318   : > { %v2105_v16 = vpop.eup %2104  ;;  %1503 = vst [vmem:[%s2711_s17 + $0x10] sm:$0xff] %v2103_v0  ;;  %v1439_v53 = vadd.f32 %v2702_v44, %v1438_v60  ;;  %v1867_v28 = vpop.f32.mrb[46].mxu0 }
 0x319   : > { %v2107_v7 = vpop.eup %2106  ;;  %1501 = vst [vmem:[%s2711_s17] sm:$0xff] %v2105_v16  ;;  %2110 = vtanh.f32 %v1447_v38  ;;  %v1450_v35 = vadd.f32 %v1867_v28, %v2702_v44  ;;  %v1441_v4 = vpop.f32.mrb[47].mxu0 }
 0x31a   : > { %v2109_v11 = vpop.eup %2108  ;;  %1504 = vst [vmem:[%s2711_s17 + $0x18] sm:$0xff] %v2107_v7  ;;  %2112 = vtanh.f32 %v1439_v53  ;;  %v1442_v48 = vadd.f32 %v2702_v44, %v1441_v4 }
 0x31b   : > { %1502 = vst [vmem:[%s2711_s17 + $0x8] sm:$0xff] %v2109_v11  ;;  %2114 = vtanh.f32 %v1450_v35 }
 0x31c   : > { %2116 = vtanh.f32 %v1442_v48 }
 0x323   : > { %v2111_v61 = vpop.eup %2110 }
 0x324   : > { %v2113_v30 = vpop.eup %2112  ;;  %1507 = vst [vmem:[%s2711_s17 + $0x30] sm:$0xff] %v2111_v61 }
 0x325   : > { %v2115_v47 = vpop.eup %2114  ;;  %1505 = vst [vmem:[%s2711_s17 + $0x20] sm:$0xff] %v2113_v30 }
 0x326   : > { %v2117_v14 = vpop.eup %2116  ;;  %1508 = vst [vmem:[%s2711_s17 + $0x38] sm:$0xff] %v2115_v47  ;;  %v1870_v45 = vpop.f32.mrb[48].mxu0 }
 0x327   : > { %1506 = vst [vmem:[%s2711_s17 + $0x28] sm:$0xff] %v2117_v14  ;;  %v1463_v40 = vadd.f32 %v1870_v45, %v2702_v44  ;;  %v1454_v55 = vpop.f32.mrb[49].mxu0 }
 0x328   : > { %v1455_v5 = vadd.f32 %v2702_v44, %v1454_v55  ;;  %v1871_v17 = vpop.f32.mrb[50].mxu0 }
 0x329   : > { %2118 = vtanh.f32 %v1463_v40  ;;  %v1466_v26 = vadd.f32 %v1871_v17, %v2702_v44  ;;  %v1457_v56 = vpop.f32.mrb[51].mxu0 }
 0x32a   : > { %2120 = vtanh.f32 %v1455_v5  ;;  %v1458_v46 = vadd.f32 %v2702_v44, %v1457_v56 }
 0x32b   : > { %2122 = vtanh.f32 %v1466_v26 }
 0x32c   : > { %2124 = vtanh.f32 %v1458_v46 }
 0x333   : > { %v2119_v57 = vpop.eup %2118 }
 0x334   : > { %v2121_v59 = vpop.eup %2120  ;;  %1511 = vst [vmem:[%s2711_s17 + $0x50] sm:$0xff] %v2119_v57 }
 0x335   : > { %v2123_v20 = vpop.eup %2122  ;;  %1509 = vst [vmem:[%s2711_s17 + $0x40] sm:$0xff] %v2121_v59 }
 0x336   : > { %v2125_v63 = vpop.eup %2124  ;;  %1512 = vst [vmem:[%s2711_s17 + $0x58] sm:$0xff] %v2123_v20  ;;  %v1874_v37 = vpop.f32.mrb[52].mxu0 }
 0x337   : > { %1510 = vst [vmem:[%s2711_s17 + $0x48] sm:$0xff] %v2125_v63  ;;  %v1479_v31 = vadd.f32 %v1874_v37, %v2702_v44  ;;  %v1470_v33 = vpop.f32.mrb[53].mxu0 }
 0x338   : > { %v1471_v51 = vadd.f32 %v2702_v44, %v1470_v33  ;;  %v1875_v22 = vpop.f32.mrb[54].mxu0 }
 0x339   : > { %2126 = vtanh.f32 %v1479_v31  ;;  %v1482_v34 = vadd.f32 %v1875_v22, %v2702_v44  ;;  %v1473_v52 = vpop.f32.mrb[55].mxu0 }
 0x33a   : > { %2128 = vtanh.f32 %v1471_v51  ;;  %v1474_v2 = vadd.f32 %v2702_v44, %v1473_v52 }
 0x33b   : > { %2130 = vtanh.f32 %v1482_v34 }
 0x33c   : > { %2132 = vtanh.f32 %v1474_v2 }
 0x341   : > { %1524 = sbr.rel (!%p2820_p6) target bundleno = 868 (0x364), region = 56 }
 0x343   : > { %v2127_v62 = vpop.eup %2126 }
 0x344   : > { %v2129_v10 = vpop.eup %2128  ;;  %1515 = vst [vmem:[%s2711_s17 + $0x70] sm:$0xff] %v2127_v62 }
 0x345   : > { %v2131_v8 = vpop.eup %2130  ;;  %1513 = vst [vmem:[%s2711_s17 + $0x60] sm:$0xff] %v2129_v10 }
 0x346   : > { %v2133_v13 = vpop.eup %2132  ;;  %1516 = vst [vmem:[%s2711_s17 + $0x78] sm:$0xff] %v2131_v8 }
 0x347   : > { %1514 = vst [vmem:[%s2711_s17 + $0x68] sm:$0xff] %v2133_v13 }
 0x348   : > { %s2827_s13 = smov (!%p1527_p9, %s1526_s13), 16 }
 0x349   : > { %s2747_s16 = sshll.u32 %s2827_s13, 7 }
 0x34a   : > { %s1531_s19 = ssub.s32 2048, %s2747_s16 }
 0x34b   : > { %1532 = vsyncadd %s2742_s15, %s1531_s19  ;;  %p1679_p10 = scmp.ne.s32.totalorder %s2747_s16, 0  ;;  %s1685_s20 = sshll.u32 %s2298_s28, 11 }
 0x34c   : > { %s2756_s22 = scalar_lea.hbm %s2810_s7, %s1685_s20  ;;  %s1537_s18 = sshll.u32 %s2711_s17, 4  ;;  %s2759_s18 = int_to_ptr.vmem [resolvable:$true] %s1537_s18 }
 0x34d   : > { %s2162_s23 = scalar_lea.vmem %s2759_s18, %s2747_s16  ;;  %s2234_s29 = smov [#allocation5]  }
 0x34e   : > { %p2163_p12 = scmp.ne.s32.totalorder %s2759_s18, %s2162_s23  ;;  %s2166_s8 = sshll.u32 %s2234_s29, 4  ;;  %s2167_s8 = int_to_ptr.vmem [resolvable:$false] %s2166_s8 }
 0x34f   : > { %s2168_s28 = scalar_lea.vmem %s2167_s8, 4096  ;;  %p2169_p4 = scmp.lt.s32.totalorder %s2759_s18, %s2167_s8 }
 0x350   : > { %p2164_p2 = pnand %p2163_p12, %p1679_p10  ;;  %p2170_p7 = scmp.lt.s32.totalorder %s2168_s28, %s2162_s23 }
 0x352   : > { %p2165_p3 = pneg %p2164_p2  ;;  %p2171_p8 = por %p2170_p7, %p2169_p4 }
 0x354   : > { %p2172_p11 = pnand %p2171_p8, %p2165_p3 }
 0x356   : > { %2175 = shalt.err (!%p2172_p11)
}
 0x357   : > { %s2176_s9 = scalar_lea.hbm %s2756_s22, %s2747_s16  ;;  %s2180_s13 = scalar_lea.hbm %s2810_s7, 3200 }
 0x358   : > { %p2177_p13 = scmp.ne.s32.totalorder %s2756_s22, %s2176_s9  ;;  %p2181_p5 = scmp.lt.u32.totalorder %s2756_s22, %s2810_s7 }
 0x359   : > { %p2182_p6 = scmp.lt.u32.totalorder %s2180_s13, %s2176_s9  ;;  %p2184_p12 = scmp.lt.u32.totalorder %s2176_s9, %s2756_s22 }
 0x35a   : > { %p2178_p1 = pnand %p2177_p13, %p1679_p10 }
 0x35b   : > { %p2183_p9 = por %p2182_p6, %p2181_p5 }
 0x35c   : > { %p2179_p0 = pneg %p2178_p1 }
 0x35d   : > { %p2185_p2 = por %p2184_p12, %p2183_p9 }
 0x35f   : > { %p2186_p3 = pnand %p2185_p2, %p2179_p0 }
 0x361   : > { %2189 = shalt.err (!%p2186_p3)
}
 0x362   : > { %s2235_s21 = smov 128   ;;  %s2236_s11 = smov 8  }
 0x363   : > { %1543 = dma.vmem_to_hbm [thread:$0]  (%p1679_p10), %s2759_s18, %s2747_s16, %s2756_s22, %s2742_s15, %s2235_s21, %s2235_s21, %s2236_s11  }
 0x364 PF: > { %p1895_p4 = scmp.ge.s32.totalorder %s2228_s27, 2  ;;  %s1552_s23 = sand.u32 1, %s2216_s24  }
 0x365   : > { %p2821_p7 = scmp.ne.s32.totalorder %s2814_s12, 0  ;;  %s1553_s29 = scalar_lea.sflag [#allocation4], %s1552_s23 }
 0x367   : > { %p1890_p8 = pnand %p1895_p4, %p2821_p7 }
 0x369   : > { %2211 = dma.done.wait (!%p1890_p8), %s1553_s29, 2048  }
 0x36a   : > { %2213 = vsyncadd (!%p1890_p8), %s1553_s29, 4294965248  ;;  %p18_p11 = scmp.ge.s32.totalorder %s2302_s30, 4   ;;  %s2822_s24 = smov %s2220_s25 }
 0x36b   : > { %s2823_s25 = smov %s2224_s26  ;;  %s2824_s26 = smov %s2313_s10 }
 0x36c   : > { %s2825_s27 = smov %s2302_s30  ;;  %20 = sbr.rel (!%p18_p11) target bundleno = 4 (0x4), region = 88 }
 0x373   :  { %1558 = vsyncpa [#allocation3], 1 }
 0x374   :  { %1560 = vsyncpa [#allocation3 + $0x1], 1 }
 0x375   :  { %1561 = vsyncpa [#allocation4], 1 }
 0x376   :  { %1563 = vsyncpa [#allocation4 + $0x1], 1 }

</bundles_post_ra>
